<compile_context>
chip_gen: v6e
topology: v6e:2x2x1
jax: 0.10.0
libtpu: 0.0.40
codegen_flags: <defaults>
</compile_context>

<pallas_src>
import jax
import jax.numpy as jnp
from jax.experimental import pallas as pl
from jax.experimental.pallas import tpu as pltpu


# ----------------------------------------------------------------------------
# Single-pair kernel: exact forward() semantics, (H,) x (H,) -> (1,)
# ----------------------------------------------------------------------------
def _dot_reduce_kernel(f_ref, h_ref, o_ref):
    # f_ref, h_ref: (1, H) in VMEM.  o_ref: (1,) in SMEM (scalar store path,
    # no padded VMEM writeback / masked partial store).
    o_ref[0] = jnp.sum(f_ref[...] * h_ref[...])


def feature_rnn_forward(features, hidden_state):
    """Pallas implementation of feature_rnn_network.forward.

    features, hidden_state: (H,) float32
    returns: (1,) float32   (matches torch: sum over dim=1 of (f*h)[None, :])
    """
    H = features.shape[0]
    f2d = features.reshape(1, H)       # metadata-only, no HBM round-trip
    h2d = hidden_state.reshape(1, H)

    out = pl.pallas_call(
        _dot_reduce_kernel,
        out_shape=jax.ShapeDtypeStruct((1,), jnp.float32),
        in_specs=[
            pl.BlockSpec(memory_space=pltpu.MemorySpace.VMEM),
            pl.BlockSpec(memory_space=pltpu.MemorySpace.VMEM),
        ],
        out_specs=pl.BlockSpec(memory_space=pltpu.MemorySpace.SMEM),
        cost_estimate=pl.CostEstimate(
            flops=2 * H, transcendentals=0, bytes_accessed=2 * H * 4 + 4
        ),
    )(f2d, h2d)
    return out


# ----------------------------------------------------------------------------
# Batched kernel: many (features, hidden_state) pairs per call.
# Inputs (B, H) each (B on sublanes, H on lanes), lane-dense (1, B) output.
# ----------------------------------------------------------------------------
_TB = 128  # batch tile: fills lanes of the output row and sublanes of inputs


def _batched_dot_kernel(f_ref, h_ref, o_ref):
    # f_ref, h_ref: (TB, H) in VMEM.  o_ref: (1, TB) in VMEM (lane-dense).
    p = f_ref[...] * h_ref[...]                      # VPU multiply
    o_ref[...] = jnp.sum(p, axis=-1)[None, :]        # XLU lane reduce, dense row


def feature_rnn_forward_batched(features, hidden_state):
    """Rowwise dot products for B pairs.

    features, hidden_state: (B, H) float32, B a multiple of 128.
    returns: (B,) float32 where out[b] = sum(features[b] * hidden_state[b]).
    """
    B, H = features.shape
    assert B % _TB == 0, "batched variant expects B to be a multiple of 128"

    out = pl.pallas_call(
        _batched_dot_kernel,
        out_shape=jax.ShapeDtypeStruct((1, B), jnp.float32),
        grid=(B // _TB,),
        in_specs=[
            pl.BlockSpec((_TB, H), lambda i: (i, 0)),
            pl.BlockSpec((_TB, H), lambda i: (i, 0)),
        ],
        out_specs=pl.BlockSpec((1, _TB), lambda i: (0, i)),
        compiler_params=pltpu.CompilerParams(
            dimension_semantics=("parallel",)   # v7x: split B across both TCs
        ),
        cost_estimate=pl.CostEstimate(
            flops=2 * B * H,
            transcendentals=0,
            bytes_accessed=2 * B * H * 4 + B * 4,
        ),
    )(features, hidden_state)
    return out.reshape(B)


# ----------------------------------------------------------------------------
# Module-init mirrors (parameters are NOT used by forward(), only update_hidden)
# ----------------------------------------------------------------------------
def init_params(input_size, hidden_size):
    """Deterministic init of the module's parameters (nn.Linear hh)."""
    key = jax.random.PRNGKey(42)
    kw, kb = jax.random.split(key)
    fan_in = input_size + hidden_size
    bound = 1.0 / jnp.sqrt(fan_in)
    w = jax.random.uniform(kw, (hidden_size, fan_in), jnp.float32, -bound, bound)
    b = jax.random.uniform(kb, (hidden_size,), jnp.float32, -bound, bound)
    return {"hh_w": w, "hh_b": b}


def init_hidden(hidden_size):
    return jnp.zeros((hidden_size,), jnp.float32)


if __name__ == "__main__":
    input_size = 32
    hidden_size = 32

    params = init_params(input_size, hidden_size)  # unused by forward, per module

    key = jax.random.PRNGKey(0)
    kf, kh, kbf, kbh = jax.random.split(key, 4)

    # --- single pair: exact forward() semantics -----------------------------
    features = jax.random.normal(kf, (hidden_size,), jnp.float32)
    hidden_state = jax.random.normal(kh, (hidden_size,), jnp.float32)

    out = feature_rnn_forward(features, hidden_state)
    out = jax.block_until_ready(out)

    ref = jnp.sum((features * hidden_state)[None, :], axis=1)
    assert out.shape == (1,)
    assert jnp.allclose(out, ref, rtol=1e-5, atol=1e-5)

    # --- batched variant (amortizes launch/DMA overhead over B pairs) -------
    B = 256
    fb = jax.random.normal(kbf, (B, hidden_size), jnp.float32)
    hb = jax.random.normal(kbh, (B, hidden_size), jnp.float32)

    out_b = feature_rnn_forward_batched(fb, hb)
    out_b = jax.block_until_ready(out_b)

    ref_b = jnp.sum(fb * hb, axis=-1)
    assert out_b.shape == (B,)
    assert jnp.allclose(out_b, ref_b, rtol=1e-5, atol=1e-5)

    print("KERNEL_OK")
</pallas_src>

<mosaic_0001>
module attributes {stable_mosaic.version = 11 : i64} {
  func.func @_dot_reduce_kernel(%arg0: memref<1x32xf32, #tpu.memory_space<vmem>>, %arg1: memref<1x32xf32, #tpu.memory_space<vmem>>, %arg2: memref<1xf32, #tpu.memory_space<smem>>) attributes {dimension_semantics = [], scalar_prefetch = 0 : i64, scratch_operands = 0 : i64, tpu.core_type = #tpu.core_type<tc>} {
    %c0 = arith.constant 0 : index
    %c0_0 = arith.constant 0 : index
    %0 = vector.load %arg0[%c0, %c0_0] : memref<1x32xf32, #tpu.memory_space<vmem>>, vector<1x32xf32>
    %c0_1 = arith.constant 0 : index
    %c0_2 = arith.constant 0 : index
    %1 = vector.load %arg1[%c0_1, %c0_2] : memref<1x32xf32, #tpu.memory_space<vmem>>, vector<1x32xf32>
    %2 = arith.mulf %0, %1 : vector<1x32xf32>
    %3 = vector.shape_cast %2 : vector<1x32xf32> to vector<1x1x32xf32>
    %cst = arith.constant dense<0.000000e+00> : vector<1xf32>
    %4 = vector.multi_reduction <add>, %3, %cst [1, 2] : vector<1x1x32xf32> to vector<1xf32>
    %5 = vector.shape_cast %4 : vector<1xf32> to vector<1x1x1xf32>
    %6 = vector.extract %5[0, 0, 0] : f32 from vector<1x1x1xf32>
    %c0_3 = arith.constant 0 : index
    %7 = memref.load %arg2[%c0_3] : memref<1xf32, #tpu.memory_space<smem>>
    memref.store %6, %arg2[%c0_3] : memref<1xf32, #tpu.memory_space<smem>>
    return
  }
}

</mosaic_0001>

<bundles_post_ra>
// kernel: tpu_custom_call.1
= control target key start
LH: loop header
LB: loop body
LE: loop exit
PB: predicated region body
PF: predicated region fallthrough
CT: control target
= control target key end

     0   :  { %7 = vsyncpa [#allocation3], 0  ;;  %s116_s0 = inlined_call_operand.hbm [shape: f32[1,32], index: 0, kind: input, shape index: {}]   ;;  %s117_s1 = inlined_call_operand.vmem [shape: f32[1,32], index: 1, kind: input, shape index: {}]   ;;  %s118_s2 = inlined_call_operand.hbm [shape: f32[1], index: 2, kind: output, shape index: {}]  }
   0x1   :  { %8 = vsyncpa [#allocation4], 0  ;;  %s90_s9 = smov [#allocation2]  }
   0x2   :  { %s15_s10 = sshll.u32 %s90_s9, 4  ;;  %s16_s10 = int_to_ptr.vmem [resolvable:$true] %s15_s10 }
   0x3   :  { %s66_s11 = scalar_lea.vmem %s16_s10, 16  ;;  %s70_s12 = scalar_lea.vmem %s16_s10, 32 }
   0x4   :  { %p67_p0 = scmp.ne.s32.totalorder %s16_s10, %s66_s11  ;;  %p71_p1 = scmp.lt.s32.totalorder %s16_s10, %s16_s10 }
   0x5   :  { %p72_p2 = scmp.lt.s32.totalorder %s70_s12, %s66_s11 }
   0x7   :  { %p73_p3 = por %p72_p2, %p71_p1 }
   0x9   :  { %p74_p4 = pnand %p73_p3, %p67_p0 }
   0xb   :  { %77 = shalt.err (!%p74_p4)
}
   0xc   :  { %18 = dma.hbm_to_vmem [thread:$0]  %s116_s0, 16, %s16_s10, [#allocation3]  }
   0xd   :  { %86 = dma.done.wait [#allocation3], 16  }
   0xe   :  { %87 = vsyncadd [#allocation3], 4294967280  ;;  %v24_v0 = vld [vmem:[#allocation2] sm:$0x1]  ;;  %vm27_vm0 = vcmask 253952   ;;  %s91_s17 = smov [#allocation5]  }
   0xf   :  { %v25_v1 = vld [vmem:[%s117_s1] sm:$0x1] }
  0x10   :  { %v26_v2 = vmul.f32 %v25_v1, %v24_v0 }
  0x12   :  { %v28_v3 = vsel %vm27_vm0, %v26_v2, 0.0 }
  0x13   :  { %29 = vadd.xlane.f32.xlu0 %v28_v3 }
  0x9c   :  { %v30_v4 = vpop.xlane.xlu0 %29 }
  0x9d   :  { %v31_v5 = vrot.slane %v30_v4, 4 }
  0x9f   :  { %v32_v6 = vadd.f32 %v31_v5, %v30_v4 }
  0xa1   :  { %v33_v7 = vrot.slane %v32_v6, 2 }
  0xa3   :  { %v34_v8 = vadd.f32 %v33_v7, %v32_v6 }
  0xa5   :  { %v35_v9 = vrot.slane %v34_v8, 1 }
  0xa7   :  { %v36_v10 = vadd.f32 %v35_v9, %v34_v8 }
  0xa9   :  { %54 = vpush %v36_v10 }
  0xda   :  { %s55_s0 = spop %54 }
  0xdb   :  { %39 = sst [smem:[#allocation5]] %s55_s0 }
  0xdc   :  { %47 = dma.smem_to_hbm %s91_s17, 16, %s118_s2, [#allocation4]  }
  0xdd   :  { %88 = dma.done.wait [#allocation4], 16  }
  0xde   :  { %89 = vsyncadd [#allocation4], 4294967280 }
  0xdf   :  { %51 = sfence }
  0xe0   :  { %52 = vsyncpa [#allocation3], 1 }
  0xe1   :  { %53 = vsyncpa [#allocation4], 1 }

</bundles_post_ra>
